<compile_context>
chip_gen: v6e
topology: v6e:2x2x1
jax: 0.10.0
libtpu: 0.0.40
codegen_flags: <defaults>
</compile_context>

<pallas_src>
import functools
from collections import defaultdict

import numpy as np
import jax
import jax.numpy as jnp
from jax.experimental import pallas as pl
from jax.experimental.pallas import tpu as pltpu

_LANE = 128
_SUBLANE = 8
_MAX_TK = 4096  # (N_pad * TK * 4B) * 2 buffers stays well under every generation's scoped VMEM


def _round_up(x, m):
    return ((x + m - 1) // m) * m


# --------------------------------------------------------------------------
# Kernel: per-row (per prior term) weighted sum of squares, K-tiled reduction.
#   x_ref   : (N_pad, TK)  mean-subtracted, zero-padded parameter rows
#   w_ref   : (N_pad, 1)   per-term weight (0 in padding rows)
#   o_ref   : (N_pad, 1)   weighted L2 loss per term
#   acc_ref : VMEM scratch (N_pad, 1) f32 accumulator
# Zero padding contributes 0^2 * w = 0, so it never perturbs the losses.
# --------------------------------------------------------------------------
def _prior_rowsum_kernel(x_ref, w_ref, o_ref, acc_ref):
    k = pl.program_id(0)

    @pl.when(k == 0)
    def _():
        acc_ref[...] = jnp.zeros_like(acc_ref)

    x = x_ref[...]
    acc_ref[...] += jnp.sum(x * x, axis=-1, keepdims=True)

    @pl.when(k == pl.num_programs(0) - 1)
    def _():
        o_ref[...] = acc_ref[...] * w_ref[...]


@functools.partial(jax.jit, static_argnames=("n_pad", "k_pad", "tk"))
def _fused_weighted_l2(xs, means, w_col, *, n_pad, k_pad, tk):
    """Pack all prior terms into a row-major slab and run one Pallas kernel.

    xs:    tuple of parameter arrays (batch-major flatten).
    means: tuple (same length) of 1-D per-sample means or None.
    w_col: (n_pad, 1) f32 per-term weights (0 in padding rows).
    Returns an (n_pad,) f32 vector of weighted L2 losses (single jit output).
    """
    rows = []
    for x, m in zip(xs, means):
        v = jnp.asarray(x, jnp.float32).reshape(x.shape[0], -1)
        if m is not None:
            v = v - jnp.asarray(m, jnp.float32).reshape(1, -1)  # fused into the pack
        v = v.reshape(-1)
        rows.append(jnp.pad(v, (0, k_pad - v.shape[0])))
    x_slab = jnp.stack(rows, axis=0)                      # (n, k_pad), lane-dense rows
    if len(rows) < n_pad:
        x_slab = jnp.pad(x_slab, ((0, n_pad - len(rows)), (0, 0)))

    out = pl.pallas_call(
        _prior_rowsum_kernel,
        out_shape=jax.ShapeDtypeStruct((n_pad, 1), jnp.float32),
        grid=(k_pad // tk,),
        in_specs=[
            pl.BlockSpec((n_pad, tk), lambda k: (0, k)),  # parameter rows, K-tiled
            pl.BlockSpec((n_pad, 1), lambda k: (0, 0)),   # weights (resident)
        ],
        out_specs=pl.BlockSpec((n_pad, 1), lambda k: (0, 0)),  # accumulator output
        scratch_shapes=[pltpu.VMEM((n_pad, 1), jnp.float32)],
        compiler_params=pltpu.CompilerParams(
            dimension_semantics=("arbitrary",)),           # K is a reduction axis
    )(x_slab, w_col)

    return out[:, 0]


# --------------------------------------------------------------------------
# RegularizerModule (JAX / Pallas version)
# --------------------------------------------------------------------------
class RegularizerModule:
    # (param key, loss key, weight attr, mean attr, skipped when penalize_only_parts)
    _PRIOR_SPECS = (
        ("betas", "shape_prior", "shape_prior_weight", None, True),
        ("expression", "expression_prior", "expression_prior_weight", None, False),
        ("body_pose", "body_pose_prior", "body_pose_prior_weight", "body_pose_mean", True),
        ("left_hand_pose", "left_hand_pose_prior", "left_hand_pose_prior_weight",
         "left_hand_pose_mean", False),
        ("right_hand_pose", "right_hand_pose_prior", "right_hand_pose_prior_weight",
         "right_hand_pose_mean", False),
        ("jaw_pose", "jaw_pose_prior", "jaw_pose_prior_weight", "jaw_pose_mean", False),
    )

    def __init__(
        self,
        loss_cfg,
        body_pose_mean=None,
        left_hand_pose_mean=None,
        right_hand_pose_mean=None,
        jaw_pose_mean=None,
    ):
        self.stages_to_regularize = loss_cfg.get("stages_to_penalize", [-1])
        self.shape_prior_weight = loss_cfg["shape"]["prior"]["weight"]
        self.expression_prior_weight = loss_cfg["expression"]["prior"]["weight"]
        self.body_pose_prior_weight = loss_cfg["body_pose"]["prior"]["weight"]
        self.left_hand_pose_prior_weight = loss_cfg["left_hand_pose"]["prior"]["weight"]
        self.right_hand_pose_prior_weight = loss_cfg["right_hand_pose"]["prior"]["weight"]
        self.jaw_pose_prior_weight = loss_cfg["jaw_pose"]["prior"]["weight"]

        # Means live on-device as flat f32 vectors; they are passed as TRACED
        # args to the fused program (so replacing a mean can never silently
        # reuse a stale cached slab).
        def _to_dev(m):
            if m is None:
                return None
            return jnp.asarray(m, jnp.float32).reshape(-1)

        self.body_pose_mean = _to_dev(body_pose_mean)
        self.left_hand_pose_mean = _to_dev(left_hand_pose_mean)
        self.right_hand_pose_mean = _to_dev(right_hand_pose_mean)
        self.jaw_pose_mean = _to_dev(jaw_pose_mean)

        # (n_pad, weights tuple) -> (n_pad, 1) device weight column
        self._w_cache = {}

    # ------------------------------------------------------------------
    def _collect_entries(self, parameters, penalize_only_parts=False):
        """List of (out_key, x, mean_or_None, weight) for one stage."""
        entries = []
        for pkey, lkey, wattr, mattr, body_only in self._PRIOR_SPECS:
            weight = getattr(self, wattr)
            if weight <= 0:
                continue
            if body_only and penalize_only_parts:
                continue
            x = parameters.get(pkey, None)
            if x is None:
                continue
            mean = getattr(self, mattr) if mattr is not None else None
            entries.append((lkey, x, mean, float(weight)))
        return entries

    # ------------------------------------------------------------------
    def _run_fused(self, entries):
        """Evaluate all prior terms with a single fused Pallas kernel call."""
        if not entries:
            return {}

        n = len(entries)
        n_pad = _round_up(n, _SUBLANE)
        sizes = [int(np.prod(e[1].shape)) for e in entries]
        max_len = max(sizes)
        tk = min(_round_up(max_len, _LANE), _MAX_TK)
        k_pad = _round_up(max_len, tk)   # grid divides exactly; padding is zeros

        # Weight column, cached per call signature (values are static config).
        w_key = (n_pad, tuple(float(e[3]) for e in entries))
        w_col = self._w_cache.get(w_key)
        if w_col is None:
            w_np = np.zeros((n_pad, 1), np.float32)
            for j, e in enumerate(entries):
                w_np[j, 0] = e[3]
            w_col = jnp.asarray(w_np)
            self._w_cache[w_key] = w_col

        xs, means = [], []
        for (_key, x, mean, _w) in entries:
            per_sample = int(np.prod(x.shape[1:])) if x.ndim > 1 else int(x.shape[-1])
            if mean is not None and int(mean.shape[0]) != per_sample:
                raise ValueError(
                    f"prior mean length {int(mean.shape[0])} does not match the "
                    f"flattened per-sample parameter dim {per_sample}")
            xs.append(x)
            means.append(mean)

        # One jitted program: XLA pack (+ fused mean subtraction) -> one Pallas
        # kernel -> ONE packed loss vector output.
        out = _fused_weighted_l2(tuple(xs), tuple(means), w_col,
                                 n_pad=n_pad, k_pad=k_pad, tk=tk)

        # Cheap eager slices of the single packed vector build the dict; the
        # packed vector itself is the only jit output / HBM copy.
        return {entries[j][0]: out[j] for j in range(n)}

    # ------------------------------------------------------------------
    def single_regularization_step(self, parameters, penalize_only_parts=False, **kw):
        return self._run_fused(
            self._collect_entries(parameters, penalize_only_parts=penalize_only_parts))

    def forward(self, param_list, num_stages=3, **kwargs):
        entries = []
        for n in range(1, num_stages + 1):
            if n not in self.stages_to_regularize:
                continue
            curr_params = param_list[n - 1]
            if curr_params is None:
                continue
            for (lkey, x, mean, w) in self._collect_entries(curr_params):
                entries.append((f"stage_{n - 1:02d}_{lkey}", x, mean, w))
        if num_stages < len(param_list):
            curr_params = param_list[-1]
            if curr_params is not None:
                for (lkey, x, mean, w) in self._collect_entries(curr_params):
                    entries.append((f"stage_{num_stages:02d}_{lkey}", x, mean, w))

        prior_losses = defaultdict(lambda: 0)
        prior_losses.update(self._run_fused(entries))
        return prior_losses

    __call__ = forward


# --------------------------------------------------------------------------
# Demo / smoke test
# --------------------------------------------------------------------------
if __name__ == "__main__":
    key = jax.random.PRNGKey(0)
    B = 2
    NUM_BETAS = 10
    NUM_EXPR = 10
    NUM_BODY_JOINTS = 21
    NUM_HAND_JOINTS = 15

    km = jax.random.split(key, 8)
    body_pose_mean = 0.1 * jax.random.normal(km[0], (NUM_BODY_JOINTS * 3,), jnp.float32)
    lhand_mean = 0.1 * jax.random.normal(km[1], (NUM_HAND_JOINTS * 3,), jnp.float32)
    rhand_mean = 0.1 * jax.random.normal(km[2], (NUM_HAND_JOINTS * 3,), jnp.float32)
    jaw_mean = 0.1 * jax.random.normal(km[3], (3,), jnp.float32)

    loss_cfg = {
        "stages_to_penalize": [1, 2, 3],
        "shape": {"prior": {"type": "l2", "weight": 1.0}},
        "expression": {"prior": {"type": "l2", "weight": 1.0}},
        "body_pose": {"prior": {"type": "l2", "weight": 0.5}},
        "left_hand_pose": {"prior": {"type": "l2", "weight": 0.1}},
        "right_hand_pose": {"prior": {"type": "l2", "weight": 0.1}},
        "jaw_pose": {"prior": {"type": "l2", "weight": 0.2}},
    }

    module = RegularizerModule(
        loss_cfg,
        body_pose_mean=body_pose_mean,
        left_hand_pose_mean=lhand_mean,
        right_hand_pose_mean=rhand_mean,
        jaw_pose_mean=jaw_mean,
    )

    def make_stage_params(k):
        ks = jax.random.split(k, 6)
        return {
            "betas": jax.random.normal(ks[0], (B, NUM_BETAS), jnp.float32),
            "expression": jax.random.normal(ks[1], (B, NUM_EXPR), jnp.float32),
            "body_pose": jax.random.normal(ks[2], (B, NUM_BODY_JOINTS, 3), jnp.float32),
            "left_hand_pose": jax.random.normal(
                ks[3], (B, NUM_HAND_JOINTS, 3), jnp.float32
            ),
            "right_hand_pose": jax.random.normal(
                ks[4], (B, NUM_HAND_JOINTS, 3), jnp.float32
            ),
            "jaw_pose": jax.random.normal(ks[5], (B, 3), jnp.float32),
        }

    stage_keys = jax.random.split(km[4], 3)
    param_list = [make_stage_params(k) for k in stage_keys]

    losses = module(param_list, num_stages=3)
    losses = jax.block_until_ready(dict(losses))

    # pure-JAX reference check
    def ref_l2(x, mean, w):
        x2d = jnp.asarray(x, jnp.float32).reshape(x.shape[0], -1)
        m2d = (
            jnp.zeros_like(x2d)
            if mean is None
            else jnp.broadcast_to(jnp.asarray(mean, jnp.float32).reshape(1, -1), x2d.shape)
        )
        return w * jnp.sum((x2d - m2d) ** 2)

    ok = True
    for n, p in enumerate(param_list):
        ref = {
            f"stage_{n:02d}_shape_prior": ref_l2(p["betas"], None, 1.0),
            f"stage_{n:02d}_expression_prior": ref_l2(p["expression"], None, 1.0),
            f"stage_{n:02d}_body_pose_prior": ref_l2(p["body_pose"], body_pose_mean, 0.5),
            f"stage_{n:02d}_left_hand_pose_prior": ref_l2(
                p["left_hand_pose"], lhand_mean, 0.1
            ),
            f"stage_{n:02d}_right_hand_pose_prior": ref_l2(
                p["right_hand_pose"], rhand_mean, 0.1
            ),
            f"stage_{n:02d}_jaw_pose_prior": ref_l2(p["jaw_pose"], jaw_mean, 0.2),
        }
        for k, v in ref.items():
            if k not in losses or not jnp.allclose(losses[k], v, rtol=1e-4, atol=1e-4):
                ok = False
                print("MISMATCH", k, losses.get(k, None), v)

    if ok:
        print("KERNEL_OK")
</pallas_src>

<mosaic_0001>
module attributes {stable_mosaic.version = 11 : i64} {
  func.func @_prior_rowsum_kernel(%arg0: i32, %arg1: memref<24x128xf32, #tpu.memory_space<vmem>>, %arg2: memref<24x1xf32, #tpu.memory_space<vmem>>, %arg3: memref<24x1xf32, #tpu.memory_space<vmem>>, %arg4: memref<24x1xf32, #tpu.memory_space<vmem>>) attributes {dimension_semantics = [#tpu.dimension_semantics<arbitrary>], iteration_bounds = array<i64: 1>, scalar_prefetch = 0 : i64, scratch_operands = 1 : i64, tpu.core_type = #tpu.core_type<tc>, window_params = [{transform_indices = @transform_0, window_bounds = array<i64: 24, 128>}, {pipeline_mode = #tpu.pipeline_mode<synchronous>, transform_indices = @transform_1, window_bounds = array<i64: 24, 1>}, {pipeline_mode = #tpu.pipeline_mode<synchronous>, transform_indices = @transform_2, window_bounds = array<i64: 24, 1>}]} {
    %c0_i32 = arith.constant 0 : i32
    %0 = arith.cmpi eq, %arg0, %c0_i32 : i32
    %1 = arith.extui %0 : i1 to i32
    %c0_i32_0 = arith.constant 0 : i32
    %2 = arith.cmpi ne, %1, %c0_i32_0 : i32
    scf.if %2 {
      %cst_8 = arith.constant 0.000000e+00 : f32
      %13 = vector.broadcast %cst_8 : f32 to vector<24x1xf32>
      %c0_9 = arith.constant 0 : index
      %c0_10 = arith.constant 0 : index
      %14 = vector.load %arg4[%c0_9, %c0_10] : memref<24x1xf32, #tpu.memory_space<vmem>>, vector<24x1xf32>
      tpu.vector_store %arg4[%c0_9, %c0_10], %13 {strides = array<i32>} : memref<24x1xf32, #tpu.memory_space<vmem>>, vector<24x1xf32>,
    } else {
    }
    %c0 = arith.constant 0 : index
    %c0_1 = arith.constant 0 : index
    %3 = vector.load %arg1[%c0, %c0_1] : memref<24x128xf32, #tpu.memory_space<vmem>>, vector<24x128xf32>
    %c0_2 = arith.constant 0 : index
    %c0_3 = arith.constant 0 : index
    %4 = vector.load %arg4[%c0_2, %c0_3] : memref<24x1xf32, #tpu.memory_space<vmem>>, vector<24x1xf32>
    %5 = arith.mulf %3, %3 : vector<24x128xf32>
    %cst = arith.constant dense<0.000000e+00> : vector<24xf32>
    %6 = vector.multi_reduction <add>, %5, %cst [1] : vector<24x128xf32> to vector<24xf32>
    %7 = vector.shape_cast %6 : vector<24xf32> to vector<24x1xf32>
    %8 = arith.addf %4, %7 : vector<24x1xf32>
    %c0_4 = arith.constant 0 : index
    %c0_5 = arith.constant 0 : index
    %9 = vector.load %arg4[%c0_4, %c0_5] : memref<24x1xf32, #tpu.memory_space<vmem>>, vector<24x1xf32>
    tpu.vector_store %arg4[%c0_4, %c0_5], %8 {strides = array<i32>} : memref<24x1xf32, #tpu.memory_space<vmem>>, vector<24x1xf32>,
    %c0_i32_6 = arith.constant 0 : i32
    %10 = arith.cmpi eq, %arg0, %c0_i32_6 : i32
    %11 = arith.extui %10 : i1 to i32
    %c0_i32_7 = arith.constant 0 : i32
    %12 = arith.cmpi ne, %11, %c0_i32_7 : i32
    scf.if %12 {
      %c0_8 = arith.constant 0 : index
      %c0_9 = arith.constant 0 : index
      %13 = vector.load %arg4[%c0_8, %c0_9] : memref<24x1xf32, #tpu.memory_space<vmem>>, vector<24x1xf32>
      %c0_10 = arith.constant 0 : index
      %c0_11 = arith.constant 0 : index
      %14 = vector.load %arg2[%c0_10, %c0_11] : memref<24x1xf32, #tpu.memory_space<vmem>>, vector<24x1xf32>
      %15 = arith.mulf %13, %14 : vector<24x1xf32>
      %c0_12 = arith.constant 0 : index
      %c0_13 = arith.constant 0 : index
      %16 = vector.load %arg3[%c0_12, %c0_13] : memref<24x1xf32, #tpu.memory_space<vmem>>, vector<24x1xf32>
      tpu.vector_store %arg3[%c0_12, %c0_13], %15 {strides = array<i32>} : memref<24x1xf32, #tpu.memory_space<vmem>>, vector<24x1xf32>,
    } else {
    }
    return
  }
  func.func @transform_0(%arg0: i32) -> (i32, i32) {
    %c0_i32 = arith.constant 0 : i32
    %c0_i32_0 = arith.constant 0 : i32
    return %c0_i32, %arg0 : i32, i32
  }
  func.func @transform_1(%arg0: i32) -> (i32, i32) {
    %c0_i32 = arith.constant 0 : i32
    %c0_i32_0 = arith.constant 0 : i32
    %c0_i32_1 = arith.constant 0 : i32
    return %c0_i32, %c0_i32_0 : i32, i32
  }
  func.func @transform_2(%arg0: i32) -> (i32, i32) {
    %c0_i32 = arith.constant 0 : i32
    %c0_i32_0 = arith.constant 0 : i32
    %c0_i32_1 = arith.constant 0 : i32
    return %c0_i32, %c0_i32_0 : i32, i32
  }
}

</mosaic_0001>

<bundles_post_ra>
// kernel: sub.0
= control target key start
LH: loop header
LB: loop body
LE: loop exit
PB: predicated region body
PF: predicated region fallthrough
CT: control target
= control target key end

     0   :  { %s34_s0 = inlined_call_operand.vmem [shape: f32[126], index: 0, kind: input, shape index: {}]   ;;  %s35_s1 = inlined_call_operand.vmem [shape: f32[126], index: 1, kind: input, shape index: {}]   ;;  %s36_s2 = inlined_call_operand.vmem [shape: f32[126], index: 2, kind: output, shape index: {}]  }
   0x1   :  { %v3_v0 = vld [vmem:[%s34_s0] sm:$0x1] }
   0x2   :  { %v4_v1 = vld [vmem:[%s35_s1] sm:$0x1] }
   0x3   :  { %v7_v2 = vsub.f32 %v3_v0, %v4_v1 }
   0x5   :  { %9 = vst [vmem:[%s36_s2] sm:$0x1] %v7_v2 }

// kernel: sub.1
= control target key start
LH: loop header
LB: loop body
LE: loop exit
PB: predicated region body
PF: predicated region fallthrough
CT: control target
= control target key end

     0   :  { %s34_s0 = inlined_call_operand.vmem [shape: f32[90], index: 0, kind: input, shape index: {}]   ;;  %s35_s1 = inlined_call_operand.vmem [shape: f32[90], index: 1, kind: input, shape index: {}]   ;;  %s36_s2 = inlined_call_operand.vmem [shape: f32[90], index: 2, kind: output, shape index: {}]  }
   0x1   :  { %v3_v0 = vld [vmem:[%s34_s0] sm:$0x1] }
   0x2   :  { %v4_v1 = vld [vmem:[%s35_s1] sm:$0x1] }
   0x3   :  { %v7_v2 = vsub.f32 %v3_v0, %v4_v1 }
   0x5   :  { %9 = vst [vmem:[%s36_s2] sm:$0x1] %v7_v2 }

// kernel: _fused_weighted_l2.1
= control target key start
LH: loop header
LB: loop body
LE: loop exit
PB: predicated region body
PF: predicated region fallthrough
CT: control target
= control target key end

     0   :  { %vm15_vm0 = vcmask 7168   ;;  %v61_v3 = vmov 0.0   ;;  %s113_s0 = inlined_call_operand.vmem [shape: f32[24,128], index: 0, kind: input, shape index: {}]   ;;  %s114_s1 = inlined_call_operand.vmem [shape: f32[24,1], index: 1, kind: input, shape index: {}]   ;;  %s115_s2 = inlined_call_operand.vmem [shape: f32[24,1], index: 2, kind: output, shape index: {}]  }
   0x1   :  { %v19_v0 = vld [vmem:[%s113_s0] sm:$0xff]  ;;  %v21_v1 = vld [vmem:[%s113_s0 + $0x10] sm:$0xff]  ;;  %v20_v2 = vld [vmem:[%s113_s0 + $0x8] sm:$0xff]  ;;  %16 = vst.msk [vmem:[#allocation2] sm:$0xff] %vm15_vm0, %v61_v3 }
   0x2   :  { %17 = vst.msk [vmem:[#allocation2 + $0x8] sm:$0xff] %vm15_vm0, %v61_v3  ;;  %18 = vst.msk [vmem:[#allocation2 + $0x10] sm:$0xff] %vm15_vm0, %v61_v3  ;;  %v25_v4 = vmul.f32 %v19_v0, %v19_v0  ;;  %v27_v5 = vmul.f32 %v21_v1, %v21_v1  ;;  %v26_v6 = vmul.f32 %v20_v2, %v20_v2  ;;  %v47_v16 = vld [vmem:[%s114_s1] sm:$0xff]  ;;  %v49_v17 = vld [vmem:[%s114_s1 + $0x10] sm:$0xff] }
   0x3   :  { %v48_v22 = vld [vmem:[%s114_s1 + $0x8] sm:$0xff] }
   0x4   :  { %28 = vadd.xlane.f32.xlu0 %v25_v4  ;;  %32 = vadd.xlane.f32.xlu1 %v27_v5 }
   0x8   :  { %30 = vadd.xlane.f32.xlu0 %v26_v6  ;;  %v22_v7 = vld [vmem:[#allocation2] sm:$0xff] }
   0x9   :  { %v24_v8 = vld [vmem:[#allocation2 + $0x10] sm:$0xff]  ;;  %v23_v13 = vld [vmem:[#allocation2 + $0x8] sm:$0xff] }
  0x8d   :  { %v29_v9 = vpop.xlane.xlu0 %28  ;;  %v33_v10 = vpop.xlane.xlu1 %32 }
  0x8e   :  { %v34_v11 = vadd.f32 %v29_v9, %v22_v7  ;;  %v36_v12 = vadd.f32 %v33_v10, %v24_v8 }
  0x90   :  { %38 = vst.msk [vmem:[#allocation2] sm:$0xff] %vm15_vm0, %v34_v11  ;;  %40 = vst.msk [vmem:[#allocation2 + $0x10] sm:$0xff] %vm15_vm0, %v36_v12 }
  0x91   :  { %v31_v14 = vpop.xlane.xlu0 %30 }
  0x92   :  { %v35_v15 = vadd.f32 %v31_v14, %v23_v13 }
  0x94   :  { %39 = vst.msk [vmem:[#allocation2 + $0x8] sm:$0xff] %vm15_vm0, %v35_v15 }
  0x97   :  { %v44_v18 = vld [vmem:[#allocation2] sm:$0xff]  ;;  %v46_v19 = vld [vmem:[#allocation2 + $0x10] sm:$0xff] }
  0x98   :  { %v50_v20 = vmul.f32 %v47_v16, %v44_v18  ;;  %v52_v21 = vmul.f32 %v49_v17, %v46_v19 }
  0x9a   :  { %53 = vst.msk [vmem:[%s115_s2] sm:$0xff] %vm15_vm0, %v50_v20  ;;  %55 = vst.msk [vmem:[%s115_s2 + $0x10] sm:$0xff] %vm15_vm0, %v52_v21 }
  0x9b   :  { %v45_v23 = vld [vmem:[#allocation2 + $0x8] sm:$0xff] }
  0x9c   :  { %v51_v24 = vmul.f32 %v48_v22, %v45_v23 }
  0x9e   :  { %54 = vst.msk [vmem:[%s115_s2 + $0x8] sm:$0xff] %vm15_vm0, %v51_v24 }

</bundles_post_ra>
